<compile_context>
chip_gen: v7x
topology: tpu7x:2x2x1
jax: 0.10.0
libtpu: 0.0.40
codegen_flags: <defaults>
</compile_context>

<pallas_src>
import functools

import jax
import jax.numpy as jnp
import numpy as np
from jax import lax
from jax.experimental import pallas as pl
from jax.experimental.pallas import tpu as pltpu

EPS = 1e-5


def convblock_kernel(x_ref, vt_ref,
                     w1_ref, cb1_ref, g1_ref, be1_ref,
                     w2_ref, cb2_ref, g2_ref, be2_ref,
                     gmat_ref,
                     out_ref,
                     xp, hp,
                     *, inv_cnt):
    N, H, Lin = x_ref.shape          # Lin = W * Cin (lane-dense)
    L = out_ref.shape[-1]            # L   = W * Cout (lane-dense)
    R = N * H

    # ---- H-halo padded input (lane-dense). Only the two border rows are zeroed;
    # the W-direction padding is absorbed into the block-Toeplitz weights.
    xp[:, 0:1, :] = jnp.zeros((N, 1, Lin), jnp.float32)
    xp[:, H + 1:H + 2, :] = jnp.zeros((N, 1, Lin), jnp.float32)
    xp[:, 1:H + 1, :] = x_ref[...] + vt_ref[...]        # fused x + time-embedding add

    # ---- conv1: 3 matmuls (one per kh), K = W*Cin, output already lane-dense ----
    acc = jnp.zeros((R, L), jnp.float32)
    for kh in range(3):
        lhs = xp[:, kh:kh + H, :].reshape(R, Lin)
        acc = acc + jnp.dot(lhs, w1_ref[kh], preferred_element_type=jnp.float32)
    acc = acc + cb1_ref[...]

    # ---- BatchNorm (batch stats) + ReLU, fully in the lane-dense layout.
    # Row-sum, then a (1,L)x(L,L) matmul with the 0/1 same-channel matrix performs
    # the per-channel group reduction AND the broadcast back across W lane groups.
    colsum = jnp.sum(acc, axis=0, keepdims=True)                                    # (1, L)
    mean_b = jnp.dot(colsum, gmat_ref[...], preferred_element_type=jnp.float32) * inv_cnt
    cent = acc - mean_b
    sqsum = jnp.sum(cent * cent, axis=0, keepdims=True)
    var_b = jnp.dot(sqsum, gmat_ref[...], preferred_element_type=jnp.float32) * inv_cnt
    h1 = jnp.maximum(cent * lax.rsqrt(var_b + EPS) * g1_ref[...] + be1_ref[...], 0.0)

    # ---- H-halo padded hidden activation for conv2 (border rows only) ----
    hp[:, 0:1, :] = jnp.zeros((N, 1, L), jnp.float32)
    hp[:, H + 1:H + 2, :] = jnp.zeros((N, 1, L), jnp.float32)
    hp[:, 1:H + 1, :] = h1.reshape(N, H, L)

    # ---- conv2 ----
    acc2 = jnp.zeros((R, L), jnp.float32)
    for kh in range(3):
        lhs = hp[:, kh:kh + H, :].reshape(R, L)
        acc2 = acc2 + jnp.dot(lhs, w2_ref[kh], preferred_element_type=jnp.float32)
    acc2 = acc2 + cb2_ref[...]

    colsum2 = jnp.sum(acc2, axis=0, keepdims=True)
    mean2_b = jnp.dot(colsum2, gmat_ref[...], preferred_element_type=jnp.float32) * inv_cnt
    cent2 = acc2 - mean2_b
    sqsum2 = jnp.sum(cent2 * cent2, axis=0, keepdims=True)
    var2_b = jnp.dot(sqsum2, gmat_ref[...], preferred_element_type=jnp.float32) * inv_cnt
    h2 = jnp.maximum(cent2 * lax.rsqrt(var2_b + EPS) * g2_ref[...] + be2_ref[...], 0.0)

    out_ref[...] = h2.reshape(N, H, L)


def _block_toeplitz(w_khkwio, W):
    """(3, 3, Cin, Cout) conv weight -> (3, W*Cin, W*Cout) per-row-tap matrices.

    The kw taps and the SAME (pad=1) boundary handling along W are folded into
    the matrix, so the kernel's lhs is the unpadded lane-dense row (W*Cin)."""
    _, _, Cin, Cout = w_khkwio.shape
    a = jnp.arange(W)[:, None]           # input column
    o = jnp.arange(W)[None, :]           # output column
    kw = a - o + 1                       # tap index; valid taps are 0..2
    valid = (kw >= 0) & (kw <= 2)
    blk = w_khkwio[:, jnp.clip(kw, 0, 2)]                         # (3, W, W, Cin, Cout)
    blk = jnp.where(valid[None, :, :, None, None], blk, 0.0)
    return jnp.transpose(blk, (0, 1, 3, 2, 4)).reshape(3, W * Cin, W * Cout)


def conv_block_forward(x_nchw, v, params):
    """x_nchw: (N, Cin, H, W) float32, v: (N, time_embed_dim) float32."""
    N, Cin, H, W = x_nchw.shape
    Cout = params["cw1"].shape[0]
    Lin, L = W * Cin, W * Cout
    hi = lax.Precision.HIGHEST

    # time-embedding MLP (Linear -> ReLU -> Linear) stays in plain JAX/XLA.
    hmid = jnp.maximum(jnp.dot(v, params["mw1"].T, precision=hi) + params["mb1"], 0.0)
    vv = jnp.dot(hmid, params["mw2"].T, precision=hi) + params["mb2"]        # (N, Cin)

    # Lane-dense activation layout: last axis index = w*C + c.
    x_d = jnp.transpose(x_nchw, (0, 2, 3, 1)).reshape(N, H, Lin)
    vt = jnp.tile(vv, (1, W)).reshape(N, 1, Lin)

    w1t = _block_toeplitz(jnp.transpose(params["cw1"], (2, 3, 1, 0)), W)     # (3, Lin, L)
    w2t = _block_toeplitz(jnp.transpose(params["cw2"], (2, 3, 1, 0)), W)     # (3, L, L)

    tile_c = lambda a: jnp.tile(a, W).reshape(1, L)                          # per-channel -> lane-dense
    gmat = (jnp.arange(L)[:, None] % Cout ==
            jnp.arange(L)[None, :] % Cout).astype(jnp.float32)               # (L, L) same-channel 0/1

    kernel = functools.partial(convblock_kernel, inv_cnt=1.0 / float(N * H * W))
    vmem = pl.BlockSpec(memory_space=pltpu.MemorySpace.VMEM)

    # TODO(synk): for production UNet shapes, add an H-tiled "parallel" grid (v7x
    # megacore) with two-pass BN (accumulate global sum/sumsq, then normalize)
    # instead of this single grid-less invocation.
    out = pl.pallas_call(
        kernel,
        out_shape=jax.ShapeDtypeStruct((N, H, L), jnp.float32),
        in_specs=[vmem] * 11,
        out_specs=vmem,
        scratch_shapes=[
            pltpu.VMEM((N, H + 2, Lin), jnp.float32),   # H-halo padded x + v
            pltpu.VMEM((N, H + 2, L), jnp.float32),     # H-halo padded hidden
        ],
        compiler_params=pltpu.CompilerParams(vmem_limit_bytes=32 * 1024 * 1024),
    )(x_d, vt,
      w1t, tile_c(params["cb1"]), tile_c(params["g1"]), tile_c(params["be1"]),
      w2t, tile_c(params["cb2"]), tile_c(params["g2"]), tile_c(params["be2"]),
      gmat)

    return jnp.transpose(out.reshape(N, H, W, Cout), (0, 3, 1, 2))           # -> NCHW


def reference(x, v, params):
    """Pure-JAX reference mirroring the PyTorch forward (training-mode BN)."""
    hi = lax.Precision.HIGHEST
    h = jnp.maximum(jnp.dot(v, params["mw1"].T, precision=hi) + params["mb1"], 0.0)
    vv = jnp.dot(h, params["mw2"].T, precision=hi) + params["mb2"]
    y = x + vv[:, :, None, None]

    def conv(z, w, b):
        o = lax.conv_general_dilated(z, w, (1, 1), "SAME",
                                     dimension_numbers=("NCHW", "OIHW", "NCHW"),
                                     precision=hi)
        return o + b[None, :, None, None]

    def bn_relu(z, g, be):
        m = jnp.mean(z, axis=(0, 2, 3), keepdims=True)
        var = jnp.mean((z - m) ** 2, axis=(0, 2, 3), keepdims=True)
        zn = (z - m) / jnp.sqrt(var + EPS)
        return jnp.maximum(zn * g[None, :, None, None] + be[None, :, None, None], 0.0)

    y = bn_relu(conv(y, params["cw1"], params["cb1"]), params["g1"], params["be1"])
    y = bn_relu(conv(y, params["cw2"], params["cb2"]), params["g2"], params["be2"])
    return y


if __name__ == "__main__":
    N, in_ch, out_ch, H, W, T = 2, 4, 8, 16, 16, 32
    ks = jax.random.split(jax.random.PRNGKey(0), 10)

    params = {
        # mlp: Linear(T, in_ch) -> ReLU -> Linear(in_ch, in_ch)   (PyTorch (out,in) layout)
        "mw1": jax.random.normal(ks[0], (in_ch, T), jnp.float32) * 0.1,
        "mb1": jax.random.normal(ks[1], (in_ch,), jnp.float32) * 0.1,
        "mw2": jax.random.normal(ks[2], (in_ch, in_ch), jnp.float32) * 0.1,
        "mb2": jax.random.normal(ks[3], (in_ch,), jnp.float32) * 0.1,
        # convs: Conv2d(in_ch, out_ch, 3) and Conv2d(out_ch, out_ch, 3)  (OIHW)
        "cw1": jax.random.normal(ks[4], (out_ch, in_ch, 3, 3), jnp.float32) * 0.1,
        "cb1": jax.random.normal(ks[5], (out_ch,), jnp.float32) * 0.1,
        "g1": jnp.ones((out_ch,), jnp.float32),
        "be1": jnp.zeros((out_ch,), jnp.float32),
        "cw2": jax.random.normal(ks[6], (out_ch, out_ch, 3, 3), jnp.float32) * 0.1,
        "cb2": jax.random.normal(ks[7], (out_ch,), jnp.float32) * 0.1,
        "g2": jnp.ones((out_ch,), jnp.float32),
        "be2": jnp.zeros((out_ch,), jnp.float32),
    }

    x = jax.random.normal(ks[8], (N, in_ch, H, W), jnp.float32)
    v = jax.random.normal(ks[9], (N, T), jnp.float32)

    y = jax.block_until_ready(conv_block_forward(x, v, params))
    assert y.shape == (N, out_ch, H, W)

    y_ref = reference(x, v, params)
    np.testing.assert_allclose(np.asarray(y), np.asarray(y_ref), rtol=2e-3, atol=2e-3)

    print("KERNEL_OK")
</pallas_src>

<mosaic_0001>
module attributes {stable_mosaic.version = 11 : i64} {
  func.func @convblock_kernel(%arg0: memref<2x16x64xf32, #tpu.memory_space<vmem>>, %arg1: memref<2x1x64xf32, #tpu.memory_space<vmem>>, %arg2: memref<3x64x128xf32, #tpu.memory_space<vmem>>, %arg3: memref<1x128xf32, #tpu.memory_space<vmem>>, %arg4: memref<1x128xf32, #tpu.memory_space<vmem>>, %arg5: memref<1x128xf32, #tpu.memory_space<vmem>>, %arg6: memref<3x128x128xf32, #tpu.memory_space<vmem>>, %arg7: memref<1x128xf32, #tpu.memory_space<vmem>>, %arg8: memref<1x128xf32, #tpu.memory_space<vmem>>, %arg9: memref<1x128xf32, #tpu.memory_space<vmem>>, %arg10: memref<128x128xf32, #tpu.memory_space<vmem>>, %arg11: memref<2x16x128xf32, #tpu.memory_space<vmem>>, %arg12: memref<2x18x64xf32, #tpu.memory_space<vmem>>, %arg13: memref<2x18x128xf32, #tpu.memory_space<vmem>>) attributes {dimension_semantics = [], scalar_prefetch = 0 : i64, scratch_operands = 2 : i64, tpu.core_type = #tpu.core_type<tc>} {
    %cst = arith.constant 0.000000e+00 : f32
    %0 = vector.broadcast %cst : f32 to vector<2x1x64xf32>
    %c0 = arith.constant 0 : index
    %c0_0 = arith.constant 0 : index
    %c0_1 = arith.constant 0 : index
    %1 = vector.load %arg12[%c0, %c0_0, %c0_1] : memref<2x18x64xf32, #tpu.memory_space<vmem>>, vector<2x1x64xf32>
    tpu.vector_store %arg12[%c0, %c0_0, %c0_1], %0 {strides = array<i32>} : memref<2x18x64xf32, #tpu.memory_space<vmem>>, vector<2x1x64xf32>,
    %cst_2 = arith.constant 0.000000e+00 : f32
    %2 = vector.broadcast %cst_2 : f32 to vector<2x1x64xf32>
    %c0_3 = arith.constant 0 : index
    %c17 = arith.constant 17 : index
    %c0_4 = arith.constant 0 : index
    %3 = vector.load %arg12[%c0_3, %c17, %c0_4] : memref<2x18x64xf32, #tpu.memory_space<vmem>>, vector<2x1x64xf32>
    tpu.vector_store %arg12[%c0_3, %c17, %c0_4], %2 {strides = array<i32>} : memref<2x18x64xf32, #tpu.memory_space<vmem>>, vector<2x1x64xf32>,
    %c0_5 = arith.constant 0 : index
    %c0_6 = arith.constant 0 : index
    %c0_7 = arith.constant 0 : index
    %4 = vector.load %arg0[%c0_5, %c0_6, %c0_7] : memref<2x16x64xf32, #tpu.memory_space<vmem>>, vector<2x16x64xf32>
    %c0_8 = arith.constant 0 : index
    %c0_9 = arith.constant 0 : index
    %c0_10 = arith.constant 0 : index
    %5 = vector.load %arg1[%c0_8, %c0_9, %c0_10] : memref<2x1x64xf32, #tpu.memory_space<vmem>>, vector<2x1x64xf32>
    %6 = vector.broadcast %5 : vector<2x1x64xf32> to vector<2x16x64xf32>
    %7 = arith.addf %4, %6 : vector<2x16x64xf32>
    %c0_11 = arith.constant 0 : index
    %c1 = arith.constant 1 : index
    %c0_12 = arith.constant 0 : index
    %8 = vector.load %arg12[%c0_11, %c1, %c0_12] : memref<2x18x64xf32, #tpu.memory_space<vmem>>, vector<2x16x64xf32>
    tpu.vector_store %arg12[%c0_11, %c1, %c0_12], %7 {strides = array<i32>} : memref<2x18x64xf32, #tpu.memory_space<vmem>>, vector<2x16x64xf32>,
    %cst_13 = arith.constant 0.000000e+00 : f32
    %9 = vector.broadcast %cst_13 : f32 to vector<32x128xf32>
    %c0_14 = arith.constant 0 : index
    %c0_15 = arith.constant 0 : index
    %c0_16 = arith.constant 0 : index
    %10 = vector.load %arg12[%c0_14, %c0_15, %c0_16] : memref<2x18x64xf32, #tpu.memory_space<vmem>>, vector<2x16x64xf32>
    %11 = vector.shape_cast %10 : vector<2x16x64xf32> to vector<32x64xf32>
    %c0_17 = arith.constant 0 : index
    %c0_18 = arith.constant 0 : index
    %c0_19 = arith.constant 0 : index
    %12 = vector.load %arg2[%c0_17, %c0_18, %c0_19] : memref<3x64x128xf32, #tpu.memory_space<vmem>>, vector<1x64x128xf32>
    %13 = vector.shape_cast %12 : vector<1x64x128xf32> to vector<64x128xf32>
    %cst_20 = arith.constant dense<0.000000e+00> : vector<32x128xf32>
    %14 = tpu.matmul %11, %13, %cst_20 {dimension_numbers = #tpu.dot_dimension_numbers<[1], [0], [0], [1], [0, 0, 1, 1], [], []>} : vector<32x64xf32>, vector<64x128xf32>, vector<32x128xf32> -> vector<32x128xf32>
    %15 = arith.addf %9, %14 : vector<32x128xf32>
    %c0_21 = arith.constant 0 : index
    %c1_22 = arith.constant 1 : index
    %c0_23 = arith.constant 0 : index
    %16 = vector.load %arg12[%c0_21, %c1_22, %c0_23] : memref<2x18x64xf32, #tpu.memory_space<vmem>>, vector<2x16x64xf32>
    %17 = vector.shape_cast %16 : vector<2x16x64xf32> to vector<32x64xf32>
    %c1_24 = arith.constant 1 : index
    %c0_25 = arith.constant 0 : index
    %c0_26 = arith.constant 0 : index
    %18 = vector.load %arg2[%c1_24, %c0_25, %c0_26] : memref<3x64x128xf32, #tpu.memory_space<vmem>>, vector<1x64x128xf32>
    %19 = vector.shape_cast %18 : vector<1x64x128xf32> to vector<64x128xf32>
    %cst_27 = arith.constant dense<0.000000e+00> : vector<32x128xf32>
    %20 = tpu.matmul %17, %19, %cst_27 {dimension_numbers = #tpu.dot_dimension_numbers<[1], [0], [0], [1], [0, 0, 1, 1], [], []>} : vector<32x64xf32>, vector<64x128xf32>, vector<32x128xf32> -> vector<32x128xf32>
    %21 = arith.addf %15, %20 : vector<32x128xf32>
    %c0_28 = arith.constant 0 : index
    %c2 = arith.constant 2 : index
    %c0_29 = arith.constant 0 : index
    %22 = vector.load %arg12[%c0_28, %c2, %c0_29] : memref<2x18x64xf32, #tpu.memory_space<vmem>>, vector<2x16x64xf32>
    %23 = vector.shape_cast %22 : vector<2x16x64xf32> to vector<32x64xf32>
    %c2_30 = arith.constant 2 : index
    %c0_31 = arith.constant 0 : index
    %c0_32 = arith.constant 0 : index
    %24 = vector.load %arg2[%c2_30, %c0_31, %c0_32] : memref<3x64x128xf32, #tpu.memory_space<vmem>>, vector<1x64x128xf32>
    %25 = vector.shape_cast %24 : vector<1x64x128xf32> to vector<64x128xf32>
    %cst_33 = arith.constant dense<0.000000e+00> : vector<32x128xf32>
    %26 = tpu.matmul %23, %25, %cst_33 {dimension_numbers = #tpu.dot_dimension_numbers<[1], [0], [0], [1], [0, 0, 1, 1], [], []>} : vector<32x64xf32>, vector<64x128xf32>, vector<32x128xf32> -> vector<32x128xf32>
    %27 = arith.addf %21, %26 : vector<32x128xf32>
    %c0_34 = arith.constant 0 : index
    %c0_35 = arith.constant 0 : index
    %28 = vector.load %arg3[%c0_34, %c0_35] : memref<1x128xf32, #tpu.memory_space<vmem>>, vector<1x128xf32>
    %29 = vector.broadcast %28 : vector<1x128xf32> to vector<32x128xf32>
    %30 = arith.addf %27, %29 : vector<32x128xf32>
    %cst_36 = arith.constant dense<0.000000e+00> : vector<128xf32>
    %31 = vector.multi_reduction <add>, %30, %cst_36 [0] : vector<32x128xf32> to vector<128xf32>
    %32 = vector.shape_cast %31 : vector<128xf32> to vector<1x128xf32>
    %c0_37 = arith.constant 0 : index
    %c0_38 = arith.constant 0 : index
    %33 = vector.load %arg10[%c0_37, %c0_38] : memref<128x128xf32, #tpu.memory_space<vmem>>, vector<128x128xf32>
    %cst_39 = arith.constant dense<0.000000e+00> : vector<1x128xf32>
    %34 = tpu.matmul %32, %33, %cst_39 {dimension_numbers = #tpu.dot_dimension_numbers<[1], [0], [0], [1], [0, 0, 1, 1], [], []>} : vector<1x128xf32>, vector<128x128xf32>, vector<1x128xf32> -> vector<1x128xf32>
    %cst_40 = arith.constant 0.001953125 : f32
    %35 = vector.broadcast %cst_40 : f32 to vector<1x128xf32>
    %36 = arith.mulf %34, %35 : vector<1x128xf32>
    %37 = vector.broadcast %36 : vector<1x128xf32> to vector<32x128xf32>
    %38 = arith.subf %30, %37 : vector<32x128xf32>
    %39 = arith.mulf %38, %38 : vector<32x128xf32>
    %cst_41 = arith.constant dense<0.000000e+00> : vector<128xf32>
    %40 = vector.multi_reduction <add>, %39, %cst_41 [0] : vector<32x128xf32> to vector<128xf32>
    %41 = vector.shape_cast %40 : vector<128xf32> to vector<1x128xf32>
    %c0_42 = arith.constant 0 : index
    %c0_43 = arith.constant 0 : index
    %42 = vector.load %arg10[%c0_42, %c0_43] : memref<128x128xf32, #tpu.memory_space<vmem>>, vector<128x128xf32>
    %cst_44 = arith.constant dense<0.000000e+00> : vector<1x128xf32>
    %43 = tpu.matmul %41, %42, %cst_44 {dimension_numbers = #tpu.dot_dimension_numbers<[1], [0], [0], [1], [0, 0, 1, 1], [], []>} : vector<1x128xf32>, vector<128x128xf32>, vector<1x128xf32> -> vector<1x128xf32>
    %cst_45 = arith.constant 0.001953125 : f32
    %44 = vector.broadcast %cst_45 : f32 to vector<1x128xf32>
    %45 = arith.mulf %43, %44 : vector<1x128xf32>
    %cst_46 = arith.constant 9.99999974E-6 : f32
    %46 = vector.broadcast %cst_46 : f32 to vector<1x128xf32>
    %47 = arith.addf %45, %46 : vector<1x128xf32>
    %48 = math.rsqrt %47 : vector<1x128xf32>
    %49 = vector.broadcast %48 : vector<1x128xf32> to vector<32x128xf32>
    %50 = arith.mulf %38, %49 : vector<32x128xf32>
    %c0_47 = arith.constant 0 : index
    %c0_48 = arith.constant 0 : index
    %51 = vector.load %arg4[%c0_47, %c0_48] : memref<1x128xf32, #tpu.memory_space<vmem>>, vector<1x128xf32>
    %52 = vector.broadcast %51 : vector<1x128xf32> to vector<32x128xf32>
    %53 = arith.mulf %50, %52 : vector<32x128xf32>
    %c0_49 = arith.constant 0 : index
    %c0_50 = arith.constant 0 : index
    %54 = vector.load %arg5[%c0_49, %c0_50] : memref<1x128xf32, #tpu.memory_space<vmem>>, vector<1x128xf32>
    %55 = vector.broadcast %54 : vector<1x128xf32> to vector<32x128xf32>
    %56 = arith.addf %53, %55 : vector<32x128xf32>
    %cst_51 = arith.constant 0.000000e+00 : f32
    %57 = vector.broadcast %cst_51 : f32 to vector<32x128xf32>
    %58 = arith.maximumf %56, %57 : vector<32x128xf32>
    %cst_52 = arith.constant 0.000000e+00 : f32
    %59 = vector.broadcast %cst_52 : f32 to vector<2x1x128xf32>
    %c0_53 = arith.constant 0 : index
    %c0_54 = arith.constant 0 : index
    %c0_55 = arith.constant 0 : index
    %60 = vector.load %arg13[%c0_53, %c0_54, %c0_55] : memref<2x18x128xf32, #tpu.memory_space<vmem>>, vector<2x1x128xf32>
    tpu.vector_store %arg13[%c0_53, %c0_54, %c0_55], %59 {strides = array<i32>} : memref<2x18x128xf32, #tpu.memory_space<vmem>>, vector<2x1x128xf32>,
    %cst_56 = arith.constant 0.000000e+00 : f32
    %61 = vector.broadcast %cst_56 : f32 to vector<2x1x128xf32>
    %c0_57 = arith.constant 0 : index
    %c17_58 = arith.constant 17 : index
    %c0_59 = arith.constant 0 : index
    %62 = vector.load %arg13[%c0_57, %c17_58, %c0_59] : memref<2x18x128xf32, #tpu.memory_space<vmem>>, vector<2x1x128xf32>
    tpu.vector_store %arg13[%c0_57, %c17_58, %c0_59], %61 {strides = array<i32>} : memref<2x18x128xf32, #tpu.memory_space<vmem>>, vector<2x1x128xf32>,
    %63 = vector.shape_cast %58 : vector<32x128xf32> to vector<2x16x128xf32>
    %c0_60 = arith.constant 0 : index
    %c1_61 = arith.constant 1 : index
    %c0_62 = arith.constant 0 : index
    %64 = vector.load %arg13[%c0_60, %c1_61, %c0_62] : memref<2x18x128xf32, #tpu.memory_space<vmem>>, vector<2x16x128xf32>
    tpu.vector_store %arg13[%c0_60, %c1_61, %c0_62], %63 {strides = array<i32>} : memref<2x18x128xf32, #tpu.memory_space<vmem>>, vector<2x16x128xf32>,
    %cst_63 = arith.constant 0.000000e+00 : f32
    %65 = vector.broadcast %cst_63 : f32 to vector<32x128xf32>
    %c0_64 = arith.constant 0 : index
    %c0_65 = arith.constant 0 : index
    %c0_66 = arith.constant 0 : index
    %66 = vector.load %arg13[%c0_64, %c0_65, %c0_66] : memref<2x18x128xf32, #tpu.memory_space<vmem>>, vector<2x16x128xf32>
    %67 = vector.shape_cast %66 : vector<2x16x128xf32> to vector<32x128xf32>
    %c0_67 = arith.constant 0 : index
    %c0_68 = arith.constant 0 : index
    %c0_69 = arith.constant 0 : index
    %68 = vector.load %arg6[%c0_67, %c0_68, %c0_69] : memref<3x128x128xf32, #tpu.memory_space<vmem>>, vector<1x128x128xf32>
    %69 = vector.shape_cast %68 : vector<1x128x128xf32> to vector<128x128xf32>
    %cst_70 = arith.constant dense<0.000000e+00> : vector<32x128xf32>
    %70 = tpu.matmul %67, %69, %cst_70 {dimension_numbers = #tpu.dot_dimension_numbers<[1], [0], [0], [1], [0, 0, 1, 1], [], []>} : vector<32x128xf32>, vector<128x128xf32>, vector<32x128xf32> -> vector<32x128xf32>
    %71 = arith.addf %65, %70 : vector<32x128xf32>
    %c0_71 = arith.constant 0 : index
    %c1_72 = arith.constant 1 : index
    %c0_73 = arith.constant 0 : index
    %72 = vector.load %arg13[%c0_71, %c1_72, %c0_73] : memref<2x18x128xf32, #tpu.memory_space<vmem>>, vector<2x16x128xf32>
    %73 = vector.shape_cast %72 : vector<2x16x128xf32> to vector<32x128xf32>
    %c1_74 = arith.constant 1 : index
    %c0_75 = arith.constant 0 : index
    %c0_76 = arith.constant 0 : index
    %74 = vector.load %arg6[%c1_74, %c0_75, %c0_76] : memref<3x128x128xf32, #tpu.memory_space<vmem>>, vector<1x128x128xf32>
    %75 = vector.shape_cast %74 : vector<1x128x128xf32> to vector<128x128xf32>
    %cst_77 = arith.constant dense<0.000000e+00> : vector<32x128xf32>
    %76 = tpu.matmul %73, %75, %cst_77 {dimension_numbers = #tpu.dot_dimension_numbers<[1], [0], [0], [1], [0, 0, 1, 1], [], []>} : vector<32x128xf32>, vector<128x128xf32>, vector<32x128xf32> -> vector<32x128xf32>
    %77 = arith.addf %71, %76 : vector<32x128xf32>
    %c0_78 = arith.constant 0 : index
    %c2_79 = arith.constant 2 : index
    %c0_80 = arith.constant 0 : index
    %78 = vector.load %arg13[%c0_78, %c2_79, %c0_80] : memref<2x18x128xf32, #tpu.memory_space<vmem>>, vector<2x16x128xf32>
    %79 = vector.shape_cast %78 : vector<2x16x128xf32> to vector<32x128xf32>
    %c2_81 = arith.constant 2 : index
    %c0_82 = arith.constant 0 : index
    %c0_83 = arith.constant 0 : index
    %80 = vector.load %arg6[%c2_81, %c0_82, %c0_83] : memref<3x128x128xf32, #tpu.memory_space<vmem>>, vector<1x128x128xf32>
    %81 = vector.shape_cast %80 : vector<1x128x128xf32> to vector<128x128xf32>
    %cst_84 = arith.constant dense<0.000000e+00> : vector<32x128xf32>
    %82 = tpu.matmul %79, %81, %cst_84 {dimension_numbers = #tpu.dot_dimension_numbers<[1], [0], [0], [1], [0, 0, 1, 1], [], []>} : vector<32x128xf32>, vector<128x128xf32>, vector<32x128xf32> -> vector<32x128xf32>
    %83 = arith.addf %77, %82 : vector<32x128xf32>
    %c0_85 = arith.constant 0 : index
    %c0_86 = arith.constant 0 : index
    %84 = vector.load %arg7[%c0_85, %c0_86] : memref<1x128xf32, #tpu.memory_space<vmem>>, vector<1x128xf32>
    %85 = vector.broadcast %84 : vector<1x128xf32> to vector<32x128xf32>
    %86 = arith.addf %83, %85 : vector<32x128xf32>
    %cst_87 = arith.constant dense<0.000000e+00> : vector<128xf32>
    %87 = vector.multi_reduction <add>, %86, %cst_87 [0] : vector<32x128xf32> to vector<128xf32>
    %88 = vector.shape_cast %87 : vector<128xf32> to vector<1x128xf32>
    %c0_88 = arith.constant 0 : index
    %c0_89 = arith.constant 0 : index
    %89 = vector.load %arg10[%c0_88, %c0_89] : memref<128x128xf32, #tpu.memory_space<vmem>>, vector<128x128xf32>
    %cst_90 = arith.constant dense<0.000000e+00> : vector<1x128xf32>
    %90 = tpu.matmul %88, %89, %cst_90 {dimension_numbers = #tpu.dot_dimension_numbers<[1], [0], [0], [1], [0, 0, 1, 1], [], []>} : vector<1x128xf32>, vector<128x128xf32>, vector<1x128xf32> -> vector<1x128xf32>
    %cst_91 = arith.constant 0.001953125 : f32
    %91 = vector.broadcast %cst_91 : f32 to vector<1x128xf32>
    %92 = arith.mulf %90, %91 : vector<1x128xf32>
    %93 = vector.broadcast %92 : vector<1x128xf32> to vector<32x128xf32>
    %94 = arith.subf %86, %93 : vector<32x128xf32>
    %95 = arith.mulf %94, %94 : vector<32x128xf32>
    %cst_92 = arith.constant dense<0.000000e+00> : vector<128xf32>
    %96 = vector.multi_reduction <add>, %95, %cst_92 [0] : vector<32x128xf32> to vector<128xf32>
    %97 = vector.shape_cast %96 : vector<128xf32> to vector<1x128xf32>
    %c0_93 = arith.constant 0 : index
    %c0_94 = arith.constant 0 : index
    %98 = vector.load %arg10[%c0_93, %c0_94] : memref<128x128xf32, #tpu.memory_space<vmem>>, vector<128x128xf32>
    %cst_95 = arith.constant dense<0.000000e+00> : vector<1x128xf32>
    %99 = tpu.matmul %97, %98, %cst_95 {dimension_numbers = #tpu.dot_dimension_numbers<[1], [0], [0], [1], [0, 0, 1, 1], [], []>} : vector<1x128xf32>, vector<128x128xf32>, vector<1x128xf32> -> vector<1x128xf32>
    %cst_96 = arith.constant 0.001953125 : f32
    %100 = vector.broadcast %cst_96 : f32 to vector<1x128xf32>
    %101 = arith.mulf %99, %100 : vector<1x128xf32>
    %cst_97 = arith.constant 9.99999974E-6 : f32
    %102 = vector.broadcast %cst_97 : f32 to vector<1x128xf32>
    %103 = arith.addf %101, %102 : vector<1x128xf32>
    %104 = math.rsqrt %103 : vector<1x128xf32>
    %105 = vector.broadcast %104 : vector<1x128xf32> to vector<32x128xf32>
    %106 = arith.mulf %94, %105 : vector<32x128xf32>
    %c0_98 = arith.constant 0 : index
    %c0_99 = arith.constant 0 : index
    %107 = vector.load %arg8[%c0_98, %c0_99] : memref<1x128xf32, #tpu.memory_space<vmem>>, vector<1x128xf32>
    %108 = vector.broadcast %107 : vector<1x128xf32> to vector<32x128xf32>
    %109 = arith.mulf %106, %108 : vector<32x128xf32>
    %c0_100 = arith.constant 0 : index
    %c0_101 = arith.constant 0 : index
    %110 = vector.load %arg9[%c0_100, %c0_101] : memref<1x128xf32, #tpu.memory_space<vmem>>, vector<1x128xf32>
    %111 = vector.broadcast %110 : vector<1x128xf32> to vector<32x128xf32>
    %112 = arith.addf %109, %111 : vector<32x128xf32>
    %cst_102 = arith.constant 0.000000e+00 : f32
    %113 = vector.broadcast %cst_102 : f32 to vector<32x128xf32>
    %114 = arith.maximumf %112, %113 : vector<32x128xf32>
    %115 = vector.shape_cast %114 : vector<32x128xf32> to vector<2x16x128xf32>
    %c0_103 = arith.constant 0 : index
    %c0_104 = arith.constant 0 : index
    %c0_105 = arith.constant 0 : index
    %116 = vector.load %arg11[%c0_103, %c0_104, %c0_105] : memref<2x16x128xf32, #tpu.memory_space<vmem>>, vector<2x16x128xf32>
    tpu.vector_store %arg11[%c0_103, %c0_104, %c0_105], %115 {strides = array<i32>} : memref<2x16x128xf32, #tpu.memory_space<vmem>>, vector<2x16x128xf32>,
    return
  }
}

</mosaic_0001>

<bundles_post_ra>
// kernel: tpu_custom_call.1
= control target key start
LH: loop header
LB: loop body
LE: loop exit
PB: predicated region body
PF: predicated region fallthrough
CT: control target
= control target key end

     0   :  { %16 = vsyncpa [#allocation5], 0  ;;  %s2494_s0 = inlined_call_operand.hbm [shape: f32[2,16,64], index: 0, kind: input, shape index: {}]   ;;  %s2495_s1 = inlined_call_operand.vmem [shape: f32[2,1,64], index: 1, kind: input, shape index: {}]   ;;  %s2496_s2 = inlined_call_operand.hbm [shape: f32[3,64,128], index: 2, kind: input, shape index: {}]   ;;  %s2497_s3 = inlined_call_operand.vmem [shape: f32[1,128], index: 3, kind: input, shape index: {}]   ;;  %s2498_s4 = inlined_call_operand.vmem [shape: f32[1,128], index: 4, kind: input, shape index: {}]   ;;  %s2499_s5 = inlined_call_operand.vmem [shape: f32[1,128], index: 5, kind: input, shape index: {}]   ;;  %s2500_s6 = inlined_call_operand.hbm [shape: f32[3,128,128], index: 6, kind: input, shape index: {}]   ;;  %s2501_s7 = inlined_call_operand.vmem [shape: f32[1,128], index: 7, kind: input, shape index: {}]   ;;  %s2502_s8 = inlined_call_operand.vmem [shape: f32[1,128], index: 8, kind: input, shape index: {}]   ;;  %s2503_s9 = inlined_call_operand.vmem [shape: f32[1,128], index: 9, kind: input, shape index: {}]   ;;  %s2504_s10 = inlined_call_operand.hbm [shape: f32[128,128], index: 10, kind: input, shape index: {}]   ;;  %s2505_s11 = inlined_call_operand.hbm [shape: f32[2,16,128], index: 11, kind: output, shape index: {}]  }
   0x1   :  { %17 = vsyncpa [#allocation8], 0 }
   0x2   :  { %18 = vsyncpa [#allocation11], 0 }
   0x3   :  { %19 = vsyncpa [#allocation6], 0  ;;  %s2173_s17 = smov [#allocation7]   ;;  %s2174_s19 = smov [#allocation4]  }
   0x4   :  { %s39_s18 = sshll.u32 %s2173_s17, 4  ;;  %s25_s20 = sshll.u32 %s2174_s19, 4  ;;  %s40_s18 = int_to_ptr.vmem [resolvable:$true] %s39_s18  ;;  %s2243_s20 = int_to_ptr.vmem [resolvable:$true] %s25_s20 }
   0x5   :  { %s2055_s23 = scalar_lea.hbm %s2496_s2, 3072 }
   0x6   :  { %p2056_p0 = scmp.ne.s32.totalorder %s2496_s2, %s2055_s23  ;;  %p2059_p1 = scmp.lt.u32.totalorder %s2055_s23, %s2496_s2 }
   0x8   :  { %p2061_p2 = pnand %p2059_p1, %p2056_p0 }
   0xa   :  { %2064 = shalt.err (!%p2061_p2)
}
   0xb   :  { %s2065_s28 = scalar_lea.vmem %s40_s18, 3072  ;;  %p2070_p4 = scmp.lt.s32.totalorder %s40_s18, %s40_s18 }
   0xc   :  { %p2066_p3 = scmp.ne.s32.totalorder %s40_s18, %s2065_s28  ;;  %p2071_p5 = scmp.lt.s32.totalorder %s2065_s28, %s2065_s28 }
   0xe   :  { %p2072_p6 = por %p2071_p5, %p2070_p4 }
  0x10   :  { %p2073_p7 = pnand %p2072_p6, %p2066_p3 }
  0x12   :  { %2076 = shalt.err (!%p2073_p7)
}
  0x13   :  { %s2175_s29 = smov 128   ;;  %s2176_s30 = smov 8  }
  0x14   :  { %45 = dma.hbm_to_vmem [thread:$0]  %s2496_s2, 3072, %s40_s18, [#allocation8], %s2175_s29, %s2175_s29, %s2176_s30  }
  0x15   :  { %s2077_s16 = scalar_lea.hbm %s2494_s0, 512 }
  0x16   :  { %p2078_p8 = scmp.ne.s32.totalorder %s2494_s0, %s2077_s16  ;;  %p2081_p9 = scmp.lt.u32.totalorder %s2077_s16, %s2494_s0 }
  0x18   :  { %p2083_p10 = pnand %p2081_p9, %p2078_p8 }
  0x1a   :  { %2086 = shalt.err (!%p2083_p10)
}
  0x1b   :  { %s2087_s23 = scalar_lea.vmem %s2243_s20, 512  ;;  %p2092_p12 = scmp.lt.s32.totalorder %s2243_s20, %s2243_s20 }
  0x1c   :  { %p2088_p11 = scmp.ne.s32.totalorder %s2243_s20, %s2087_s23  ;;  %p2093_p13 = scmp.lt.s32.totalorder %s2087_s23, %s2087_s23 }
  0x1e   :  { %p2094_p0 = por %p2093_p13, %p2092_p12 }
  0x20   :  { %p2095_p1 = pnand %p2094_p0, %p2088_p11 }
  0x22   :  { %2098 = shalt.err (!%p2095_p1)
}
  0x23   :  { %31 = dma.hbm_to_vmem [thread:$0]  %s2494_s0, 512, %s2243_s20, [#allocation5], %s2175_s29, %s2175_s29, %s2176_s30  }
  0x24   :  { %s2177_s24 = smov [#allocation9]   ;;  %s2178_s26 = smov [#allocation10]  }
  0x25   :  { %s57_s25 = sshll.u32 %s2177_s24, 4  ;;  %s75_s27 = sshll.u32 %s2178_s26, 4  ;;  %s58_s25 = int_to_ptr.vmem [resolvable:$true] %s57_s25  ;;  %s2280_s27 = int_to_ptr.vmem [resolvable:$true] %s75_s27 }
  0x26   :  { %s2099_s13 = scalar_lea.hbm %s2500_s6, 6144 }
  0x27   :  { %p2100_p2 = scmp.ne.s32.totalorder %s2500_s6, %s2099_s13  ;;  %p2103_p3 = scmp.lt.u32.totalorder %s2099_s13, %s2500_s6 }
  0x29   :  { %p2105_p4 = pnand %p2103_p3, %p2100_p2 }
  0x2b   :  { %2108 = shalt.err (!%p2105_p4)
}
  0x2c   :  { %s2109_s0 = scalar_lea.vmem %s58_s25, 6144  ;;  %p2114_p6 = scmp.lt.s32.totalorder %s58_s25, %s58_s25 }
  0x2d   :  { %p2110_p5 = scmp.ne.s32.totalorder %s58_s25, %s2109_s0  ;;  %p2115_p7 = scmp.lt.s32.totalorder %s2109_s0, %s2109_s0 }
  0x2f   :  { %p2116_p8 = por %p2115_p7, %p2114_p6 }
  0x31   :  { %p2117_p9 = pnand %p2116_p8, %p2110_p5 }
  0x33   :  { %2120 = shalt.err (!%p2117_p9)
}
  0x34   :  { %63 = dma.hbm_to_vmem [thread:$0]  %s2500_s6, 6144, %s58_s25, [#allocation8], %s2175_s29, %s2175_s29, %s2176_s30  }
  0x35   :  { %s2121_s23 = scalar_lea.hbm %s2504_s10, 2048 }
  0x36   :  { %p2122_p10 = scmp.ne.s32.totalorder %s2504_s10, %s2121_s23  ;;  %p2125_p11 = scmp.lt.u32.totalorder %s2121_s23, %s2504_s10 }
  0x38   :  { %p2127_p12 = pnand %p2125_p11, %p2122_p10 }
  0x3a   :  { %2130 = shalt.err (!%p2127_p12)
}
  0x3b   :  { %s2131_s28 = scalar_lea.vmem %s2280_s27, 2048  ;;  %p2136_p0 = scmp.lt.s32.totalorder %s2280_s27, %s2280_s27 }
  0x3c   :  { %p2132_p13 = scmp.ne.s32.totalorder %s2280_s27, %s2131_s28  ;;  %p2137_p1 = scmp.lt.s32.totalorder %s2131_s28, %s2131_s28 }
  0x3e   :  { %p2138_p2 = por %p2137_p1, %p2136_p0 }
  0x40   :  { %p2139_p3 = pnand %p2138_p2, %p2132_p13 }
  0x42   :  { %2142 = shalt.err (!%p2139_p3)
}
  0x43   :  { %81 = dma.hbm_to_vmem [thread:$0]  %s2504_s10, 2048, %s2280_s27, [#allocation11], %s2175_s29, %s2175_s29, %s2176_s30  }
  0x44   :  { %2165 = dma.done.wait [#allocation5], 512  }
  0x45   :  { %2166 = vsyncadd [#allocation5], 4294966784 }
  0x46   :  { %2167 = dma.done.wait [#allocation8], 9216  }
  0x47   :  { %2168 = vsyncadd [#allocation8], 4294958080 }
  0x48   :  { %2169 = dma.done.wait [#allocation11], 2048  }
  0x49   :  { %2170 = vsyncadd [#allocation11], 4294965248  ;;  %vm94_vm0 = vcmask 516096   ;;  %v2179_v0 = vmov 0.0   ;;  %v130_v1 = vld [vmem:[#allocation7] sm:$0xff]  ;;  %v131_v2 = vld [vmem:[#allocation7 + $0x8] sm:$0xff] }
  0x4a   :  { %95 = vst.msk [vmem:[#allocation2] sm:$0x1] %vm94_vm0, %v2179_v0  ;;  %96 = vst.msk [vmem:[#allocation2 + $0x18] sm:$0x1] %vm94_vm0, %v2179_v0  ;;  %v132_v3 = vld [vmem:[#allocation7 + $0x10] sm:$0xff]  ;;  %v1801_v4 = vpack.c.bf16 %v131_v2, %v130_v1  ;;  %v133_v5 = vld [vmem:[#allocation7 + $0x18] sm:$0xff] }
  0x4b   :  { %97 = vst.msk [vmem:[#allocation2 + $0x11] sm:$0x1] %vm94_vm0, %v2179_v0  ;;  %98 = vst.msk [vmem:[#allocation2 + $0x29] sm:$0x1] %vm94_vm0, %v2179_v0  ;;  %v1805_v6 = vpack.c.bf16 %v133_v5, %v132_v3  ;;  %v134_v7 = vld [vmem:[#allocation7 + $0x20] sm:$0xff]  ;;  %v135_v8 = vld [vmem:[#allocation7 + $0x28] sm:$0xff] }
  0x4c   :  { %694 = vst [vmem:[#allocation3] sm:$0x1] %v2179_v0  ;;  %695 = vst [vmem:[#allocation3 + $0x18] sm:$0x1] %v2179_v0  ;;  %v143_v9 = vld [vmem:[#allocation7 + $0x40] sm:$0xff]  ;;  %1802 = vmatprep.subr.bf16.mxu0 %v1801_v4  ;;  %v144_v10 = vld [vmem:[#allocation7 + $0x48] sm:$0xff]  ;;  %v1809_v15 = vpack.c.bf16 %v135_v8, %v134_v7 }
  0x4d   :  { %696 = vst [vmem:[#allocation3 + $0x11] sm:$0x1] %v2179_v0  ;;  %697 = vst [vmem:[#allocation3 + $0x29] sm:$0x1] %v2179_v0  ;;  %v99_v11 = vld [vmem:[#allocation4] sm:$0xff]  ;;  %v100_v12 = vld [vmem:[#allocation4 + $0x8] sm:$0xff]  ;;  %1804 = vmatpush3.bf16.msra.mxu0 %v1801_v4  ;;  %v1785_v13 = vpack.c.bf16 %v144_v10, %v143_v9 }
  0x4e   :  { %v1281_v14 = vld [vmem:[%s2495_s1] ss:$0 sm:$0xff]  ;;  %vm121_vm1 = vcmask 523264   ;;  %1806 = vmatprep.subr.bf16.mxu0 %v1805_v6  ;;  %v136_v16 = vld [vmem:[#allocation7 + $0x30] sm:$0xff]  ;;  %v146_v20 = vld [vmem:[#allocation7 + $0x58] sm:$0xff]  ;;  %v2180_v54 = vmov 0.0|0.0  }
  0x4f   :  { %v117_v17 = vadd.f32 %v1281_v14, %v99_v11  ;;  %v118_v18 = vadd.f32 %v1281_v14, %v100_v12  ;;  %v145_v19 = vld [vmem:[#allocation7 + $0x50] sm:$0xff]  ;;  %v137_v21 = vld [vmem:[#allocation7 + $0x38] sm:$0xff]  ;;  %1786 = vmatprep.subr.bf16.mxu1 %v1785_v13  ;;  %v147_v23 = vld [vmem:[#allocation7 + $0x60] sm:$0xff]  ;;  %vm2181_vm2 = vmmov 0   ;;  %s2182_s21 = smov [#allocation12]  }
  0x50   :  { %v1789_v22 = vpack.c.bf16 %v146_v20, %v145_v19  ;;  %v148_v24 = vld [vmem:[#allocation7 + $0x68] sm:$0xff]  ;;  %1788 = vmatpush3.bf16.msra.mxu1 %v1785_v13  ;;  %v101_v26 = vld [vmem:[#allocation4 + $0x10] sm:$0xff]  ;;  %v1282_v27 = vld [vmem:[%s2495_s1 + $0x1] ss:$0 sm:$0xff]  ;;  %v1813_v28 = vpack.c.bf16 %v137_v21, %v136_v16  ;;  %s1267_s22 = sshll.u32 %s2182_s21, 4  ;;  %s1268_s22 = int_to_ptr.vmem [resolvable:$true] %s1267_s22 }
  0x51   :  { %122 = vst.msk [vmem:[#allocation2 + $0x1] sm:$0xff] %vm121_vm1, %v117_v17  ;;  %123 = vst.msk [vmem:[#allocation2 + $0x9] sm:$0xff] %vm121_vm1, %v118_v18  ;;  %1808 = vmatpush3.bf16.msra.mxu0 %v1805_v6  ;;  %v1793_v25 = vpack.c.bf16 %v148_v24, %v147_v23  ;;  %v149_v29 = vld [vmem:[#allocation7 + $0x70] sm:$0xff]  ;;  %v150_v30 = vld [vmem:[#allocation7 + $0x78] sm:$0xff]  ;;  %v119_v31 = vadd.f32 %v1282_v27, %v101_v26  ;;  %p2148_p5 = scmp.lt.s32.totalorder %s1268_s22, %s1268_s22 }
  0x52   :  { %1790 = vmatprep.subr.bf16.mxu1 %v1789_v22  ;;  %1810 = vmatprep.subr.bf16.mxu0 %v1809_v15  ;;  %v102_v32 = vld [vmem:[#allocation4 + $0x18] sm:$0xff]  ;;  %v350_v33 = vld [vmem:[#allocation7 + $0x80] sm:$0xff]  ;;  %v351_v34 = vld [vmem:[#allocation7 + $0x88] sm:$0xff]  ;;  %v1797_v36 = vpack.c.bf16 %v150_v30, %v149_v29 }
  0x53   :  { %v120_v35 = vadd.f32 %v1282_v27, %v102_v32  ;;  %124 = vst.msk [vmem:[#allocation2 + $0x19] sm:$0xff] %vm121_vm1, %v119_v31  ;;  %v1817_v37 = vpack.c.bf16 %v351_v34, %v350_v33  ;;  %v352_v38 = vld [vmem:[#allocation7 + $0x90] sm:$0xff]  ;;  %v353_v40 = vld [vmem:[#allocation7 + $0x98] sm:$0xff]  ;;  %v354_v44 = vld [vmem:[#allocation7 + $0xa0] sm:$0xff] }
  0x54   :  { %1792 = vmatpush3.bf16.msra.mxu1 %v1789_v22  ;;  %v1821_v43 = vpack.c.bf16 %v353_v40, %v352_v38  ;;  %v355_v45 = vld [vmem:[#allocation7 + $0xa8] sm:$0xff]  ;;  %v479_v47 = vld [vmem:[#allocation10] sm:$0xff]  ;;  %v356_v56 = vld [vmem:[#allocation7 + $0xb0] sm:$0xff] }
  0x55   :  { %1812 = vmatpush3.bf16.msra.mxu0 %v1809_v15  ;;  %1794 = vmatprep.subr.bf16.mxu1 %v1793_v25  ;;  %125 = vst.msk [vmem:[#allocation2 + $0x21] sm:$0xff] %vm121_vm1, %v120_v35  ;;  %v480_v48 = vld [vmem:[#allocation10 + $0x8] sm:$0xff]  ;;  %v1825_v52 = vpack.c.bf16 %v355_v45, %v354_v44  ;;  %v357_v57 = vld [vmem:[#allocation7 + $0xb8] sm:$0xff]  ;;  %v481_v63 = vld [vmem:[#allocation10 + $0x10] sm:$0xff] }
  0x56   :  { %1814 = vmatprep.subr.bf16.mxu0 %v1813_v28  ;;  %v2340_v55 = vpack.c.bf16 %v480_v48, %v479_v47  ;;  %v1829_v59 = vpack.c.bf16 %v357_v57, %v356_v56  ;;  %v482_v1 = vld [vmem:[#allocation10 + $0x18] sm:$0xff]  ;;  %v483_v3 = vld [vmem:[#allocation10 + $0x20] sm:$0xff]  ;;  %v484_v4 = vld [vmem:[#allocation10 + $0x28] sm:$0xff]  ;;  %v566_v47 = vlaneseq }
  0x57   :  { %v2352_v2 = vpack.c.bf16 %v482_v1, %v481_v63  ;;  %v2356_v5 = vpack.c.bf16 %v484_v4, %v483_v3  ;;  %v485_v6 = vld [vmem:[#allocation10 + $0x30] sm:$0xff]  ;;  %v486_v7 = vld [vmem:[#allocation10 + $0x38] sm:$0xff]  ;;  %v487_v9 = vld [vmem:[#allocation10 + $0x40] sm:$0xff] }
  0x58   :  { %v126_v39 = vld [vmem:[#allocation2] sm:$0xff]  ;;  %1796 = vmatpush3.bf16.msra.mxu1 %v1793_v25  ;;  %v127_v42 = vld [vmem:[#allocation2 + $0x8] sm:$0xff]  ;;  %v2360_v8 = vpack.c.bf16 %v486_v7, %v485_v6  ;;  %v489_v12 = vld [vmem:[#allocation10 + $0x50] sm:$0xff]  ;;  %v567_v48 = vshrl.u32 %v566_v47, 7 }
  0x59   :  { %v138_v41 = vld [vmem:[#allocation2 + $0x1] sm:$0xff]  ;;  %1503 = vmatprep.mubr.msk.f32.mxu0 %vm121_vm1, %v126_v39  ;;  %1816 = vmatpush3.bf16.msra.mxu0 %v1813_v28  ;;  %v139_v49 = vld [vmem:[#allocation2 + $0x9] sm:$0xff]  ;;  %v490_v13 = vld [vmem:[#allocation10 + $0x58] sm:$0xff] }
  0x5a   :  { %1798 = vmatprep.subr.bf16.mxu1 %v1797_v36  ;;  %1818 = vmatprep.subr.bf16.mxu0 %v1817_v37  ;;  %v128_v46 = vld [vmem:[#allocation2 + $0x18] sm:$0xff]  ;;  %v345_v53 = vld [vmem:[#allocation2 + $0x2] sm:$0xff]  ;;  %v346_v60 = vld [vmem:[#allocation2 + $0xa] sm:$0xff]  ;;  %v2368_v14 = vpack.c.bf16 %v490_v13, %v489_v12 }
  0x5b   :  { %1481 = vmatprep.mubr.msk.f32.mxu1 %vm121_vm1, %v138_v41  ;;  %v140_v51 = vld [vmem:[#allocation2 + $0x19] sm:$0xff]  ;;  %v488_v10 = vld [vmem:[#allocation10 + $0x48] sm:$0xff]  ;;  %v493_v18 = vld [vmem:[#allocation10 + $0x70] sm:$0xff] }
  0x5c   :  { %1504 = vmatmul.mubr.msk.f32.vlgmr.msra.gmra.mrb[0].mxu0 %vm121_vm1, %v127_v42  ;;  %1800 = vmatpush3.bf16.msra.mxu1 %v1797_v36  ;;  %v129_v50 = vld [vmem:[#allocation2 + $0x20] sm:$0xff]  ;;  %v2364_v11 = vpack.c.bf16 %v488_v10, %v487_v9  ;;  %v492_v16 = vld [vmem:[#allocation10 + $0x68] sm:$0xff]  ;;  %v494_v19 = vld [vmem:[#allocation10 + $0x78] sm:$0xff] }
  0x5d   :  { %1820 = vmatpush3.bf16.msra.mxu0 %v1817_v37  ;;  %1506 = vmatprep.mubr.msk.f32.mxu0 %vm121_vm1, %v128_v46  ;;  %v141_v58 = vld [vmem:[#allocation2 + $0x21] sm:$0xff]  ;;  %v2376_v20 = vpack.c.bf16 %v494_v19, %v493_v18  ;;  %v1295_v27 = vld [vmem:[%s2497_s3] ss:$0 sm:$0xff]  ;;  %v729_v19 = vld [vmem:[#allocation9 + $0x90] sm:$0xff] }
  0x5e   :  { %1822 = vmatprep.subr.bf16.mxu0 %v1821_v43  ;;  %1833 = vmatprep.subr.bf16.mxu1 %v2180_v54  ;;  %v347_v61 = vld [vmem:[#allocation2 + $0x1a] sm:$0xff]  ;;  %v348_v62 = vld [vmem:[#allocation2 + $0x22] sm:$0xff] }
  0x5f   :  { %1482 = vmatmul.mubr.msk.f32.vlgmr.msra.gmra.mrb[0].mxu1 %vm121_vm1, %v139_v49  ;;  %v491_v15 = vld [vmem:[#allocation10 + $0x60] sm:$0xff]  ;;  %v2403_v49 = vsub.s32 0, %v567_v48 }
  0x60   :  { %1507 = vmatmul.mubr.msk.f32.gmra.mrb[2].mxu0 %vm121_vm1, %v129_v50  ;;  %1484 = vmatprep.mubr.msk.f32.mxu1 %vm121_vm1, %v140_v51  ;;  %v2372_v17 = vpack.c.bf16 %v492_v16, %v491_v15  ;;  %v727_v15 = vld [vmem:[#allocation9 + $0x80] sm:$0xff]  ;;  %v728_v16 = vld [vmem:[#allocation9 + $0x88] sm:$0xff] }
  0x61   :  { %1824 = vmatpush3.bf16.msra.mxu0 %v1821_v43  ;;  %1525 = vmatprep.mubr.msk.f32.mxu0 %vm121_vm1, %v345_v53  ;;  %v1881_v18 = vpack.c.bf16 %v728_v16, %v727_v15 }
  0x62   :  { %1826 = vmatprep.subr.bf16.mxu0 %v1825_v52  ;;  %1835 = vmatpush3.bf16.msra.mxu1 %v2340_v55 }
  0x63   :  { %1485 = vmatmul.mubr.msk.f32.gmra.mrb[2].mxu1 %vm121_vm1, %v141_v58  ;;  %1836 = vmatprep.subr.bf16.mxu1 %v2180_v54 }
  0x64   :  { %1563 = vmatprep.mubr.msk.f32.mxu1 %vm2181_vm2, %v2179_v0 }
  0x65   :  { %1828 = vmatpush3.bf16.msra.mxu0 %v1825_v52 }
  0x66   :  { %1830 = vmatprep.subr.bf16.mxu0 %v1829_v59  ;;  %1838 = vmatpush3.bf16.msra.mxu1 %v2352_v2 }
  0x67   :  { %1839 = vmatprep.subr.bf16.mxu1 %v2180_v54 }
  0x69   :  { %1832 = vmatpush3.bf16.msra.mxu0 %v1829_v59 }
  0x6a   :  { %1841 = vmatpush3.bf16.msra.mxu1 %v2356_v5  ;;  %1882 = vmatprep.subr.bf16.mxu0 %v1881_v18 }
  0x6b   :  { %1842 = vmatprep.subr.bf16.mxu1 %v2180_v54 }
  0x6c   :  { %1526 = vmatmul.mubr.msk.f32.vlgmr.msra.gmra.mrb[0].mxu0 %vm121_vm1, %v346_v60 }
  0x6d   :  { %1528 = vmatprep.mubr.msk.f32.mxu0 %vm121_vm1, %v347_v61  ;;  %1884 = vmatpush3.bf16.msra.mxu0 %v1881_v18  ;;  %v711_v18 = vld [vmem:[#allocation9 + $0x28] sm:$0xff] }
  0x6e   :  { %1844 = vmatpush3.bf16.msra.mxu1 %v2360_v8 }
  0x6f   :  { %1845 = vmatprep.subr.bf16.mxu1 %v2180_v54 }
  0x70   :  { %1529 = vmatmul.mubr.msk.f32.gmra.mrb[2].mxu0 %vm121_vm1, %v348_v62 }
  0x72   :  { %1847 = vmatpush3.bf16.msra.mxu1 %v2364_v11 }
  0x73   :  { %1848 = vmatprep.subr.bf16.mxu1 %v2180_v54 }
  0x76   :  { %1850 = vmatpush3.bf16.msra.mxu1 %v2368_v14 }
  0x77   :  { %1851 = vmatprep.subr.bf16.mxu1 %v2180_v54 }
  0x7a   :  { %1853 = vmatpush3.bf16.msra.mxu1 %v2372_v17 }
  0x7b   :  { %1854 = vmatprep.subr.bf16.mxu1 %v2180_v54 }
  0x7e   :  { %1856 = vmatpush3.bf16.msra.mxu1 %v2376_v20 }
  0x7f   :  { %1857 = vmatprep.subr.bf16.mxu1 %v2180_v54 }
 0x132   :  { %v1483_v21 = vpop.f32.mrb[0].mxu1 }
 0x133   :  { %v229_v22 = vpop.f32.mrb[1].mxu1 }
 0x136   :  { %v1486_v23 = vpop.f32.mrb[2].mxu1 }
 0x137   :  { %v239_v24 = vpop.f32.mrb[3].mxu1 }
 0x13f   :  { %v1527_v25 = vpop.f32.mrb[0].mxu0 }
 0x140   :  { %v2025_v26 = vadd.f32 %v1527_v25, %v1483_v21  ;;  %v436_v28 = vpop.f32.mrb[1].mxu0  ;;  %v730_v21 = vld [vmem:[#allocation9 + $0x98] sm:$0xff] }
 0x141   :  { %v2026_v29 = vadd.f32 %v436_v28, %v229_v22  ;;  %v1885_v22 = vpack.c.bf16 %v730_v21, %v729_v19  ;;  %v712_v21 = vld [vmem:[#allocation9 + $0x30] sm:$0xff] }
 0x142   :  { %v467_v30 = vadd.f32 %v2025_v26, %v1295_v27  ;;  %v733_v26 = vld [vmem:[#allocation9 + $0xb0] sm:$0xff] }
 0x143   :  { %v466_v31 = vadd.f32 %v2026_v29, %v1295_v27  ;;  %v1530_v32 = vpop.f32.mrb[2].mxu0  ;;  %1886 = vmatprep.subr.bf16.mxu0 %v1885_v22  ;;  %v735_v29 = vld [vmem:[#allocation9 + $0xc0] sm:$0xff] }
 0x144   :  { %v2027_v33 = vadd.f32 %v1530_v32, %v1486_v23  ;;  %v446_v34 = vpop.f32.mrb[3].mxu0  ;;  %1888 = vmatpush3.bf16.msra.mxu0 %v1885_v22  ;;  %v731_v23 = vld [vmem:[#allocation9 + $0xa0] sm:$0xff]  ;;  %v737_v32 = vld [vmem:[#allocation9 + $0xd0] sm:$0xff]  ;;  %v713_v22 = vld [vmem:[#allocation9 + $0x38] sm:$0xff] }
 0x145   :  { %v2028_v35 = vadd.f32 %v446_v34, %v239_v24  ;;  %v470_v36 = vadd.f32 %v467_v30, %v466_v31  ;;  %v732_v24 = vld [vmem:[#allocation9 + $0xa8] sm:$0xff] }
 0x146   :  { %v469_v38 = vadd.f32 %v2027_v33, %v1295_v27  ;;  %v1889_v25 = vpack.c.bf16 %v732_v24, %v731_v23  ;;  %v738_v33 = vld [vmem:[#allocation9 + $0xd8] sm:$0xff]  ;;  %v1925_v24 = vpack.c.bf16 %v713_v22, %v712_v21 }
 0x147   :  { %v468_v37 = vadd.f32 %v2028_v35, %v1295_v27  ;;  %v734_v27 = vld [vmem:[#allocation9 + $0xb8] sm:$0xff]  ;;  %v1901_v34 = vpack.c.bf16 %v738_v33, %v737_v32  ;;  %v739_v35 = vld [vmem:[#allocation9 + $0xe0] sm:$0xff]  ;;  %v719_v32 = vld [vmem:[#allocation9 + $0x68] sm:$0xff] }
 0x148   :  { %1890 = vmatprep.subr.bf16.mxu0 %v1889_v25  ;;  %v1893_v28 = vpack.c.bf16 %v734_v27, %v733_v26  ;;  %v715_v26 = vld [vmem:[#allocation9 + $0x48] sm:$0xff] }
 0x149   :  { %v471_v39 = vadd.f32 %v470_v36, %v468_v37  ;;  %1892 = vmatpush3.bf16.msra.mxu0 %v1889_v25  ;;  %v740_v36 = vld [vmem:[#allocation9 + $0xe8] sm:$0xff]  ;;  %v714_v25 = vld [vmem:[#allocation9 + $0x40] sm:$0xff] }
 0x14a   :  { %1894 = vmatprep.subr.bf16.mxu0 %v1893_v28  ;;  %v1929_v27 = vpack.c.bf16 %v715_v26, %v714_v25 }
 0x14b   :  { %v472_v40 = vadd.f32 %v471_v39, %v469_v38  ;;  %v742_v39 = vld [vmem:[#allocation9 + $0xf8] sm:$0xff] }
 0x14d   :  { %v473_v41 = vrot.slane %v472_v40, 4  ;;  %1896 = vmatpush3.bf16.msra.mxu0 %v1893_v28  ;;  %v716_v28 = vld [vmem:[#allocation9 + $0x50] sm:$0xff] }
 0x14f   :  { %v474_v42 = vadd.f32 %v473_v41, %v472_v40  ;;  %v706_v41 = vld [vmem:[#allocation9] sm:$0xff] }
 0x151   :  { %v475_v43 = vrot.slane %v474_v42, 2 }
 0x153   :  { %v476_v44 = vadd.f32 %v475_v43, %v474_v42  ;;  %v707_v42 = vld [vmem:[#allocation9 + $0x8] sm:$0xff] }
 0x154   :  { %v1913_v43 = vpack.c.bf16 %v707_v42, %v706_v41  ;;  %v921_v41 = vld [vmem:[#allocation9 + $0x118] sm:$0xff] }
 0x155   :  { %v477_v45 = vrot.slane %v476_v44, 1 }
 0x157   :  { %v478_v46 = vadd.f32 %v477_v45, %v476_v44 }
 0x159   :  { %1564 = vmatmul.mubr.f32.vlgmr.msra.gmra.mrb[4].mxu1 %v478_v46 }
 0x15a   :  { %1859 = vmatpush3.bf16.msra.mxu1 %v2340_v55  ;;  %1598 = vmatprep.mubr.msk.f32.mxu1 %vm2181_vm2, %v2179_v0 }
 0x15b   :  { %1860 = vmatprep.subr.bf16.mxu1 %v2180_v54 }
 0x15e   :  { %1862 = vmatpush3.bf16.msra.mxu1 %v2352_v2 }
 0x15f   :  { %1863 = vmatprep.subr.bf16.mxu1 %v2180_v54 }
 0x162   :  { %1865 = vmatpush3.bf16.msra.mxu1 %v2356_v5 }
 0x163   :  { %1866 = vmatprep.subr.bf16.mxu1 %v2180_v54 }
 0x166   :  { %1868 = vmatpush3.bf16.msra.mxu1 %v2360_v8 }
 0x167   :  { %1869 = vmatprep.subr.bf16.mxu1 %v2180_v54 }
 0x16a   :  { %1871 = vmatpush3.bf16.msra.mxu1 %v2364_v11 }
 0x16b   :  { %1872 = vmatprep.subr.bf16.mxu1 %v2180_v54 }
 0x16e   :  { %1874 = vmatpush3.bf16.msra.mxu1 %v2368_v14 }
 0x16f   :  { %1875 = vmatprep.subr.bf16.mxu1 %v2180_v54 }
 0x172   :  { %1877 = vmatpush3.bf16.msra.mxu1 %v2372_v17 }
 0x173   :  { %1878 = vmatprep.subr.bf16.mxu1 %v2180_v54 }
 0x176   :  { %1880 = vmatpush3.bf16.msra.mxu1 %v2376_v20 }
 0x177   :  { %1977 = vmatprep.subr.bf16.mxu1 %v2180_v54 }
 0x22c   :  { %v561_v50 = vpop.f32.mrb[4].mxu1 }
 0x22d   :  { %v565_v51 = vmul.f32 0.001953125, %v561_v50  ;;  %v1565_v52 = vpop.f32.mrb[5].mxu1 }
 0x22f   :  { %v569_v53 = vrot.slane %v565_v51, %v2403_v49  ;;  %v1296_v51 = vld [vmem:[%s2498_s4] ss:$0 sm:$0xff] }
 0x231   :  { %v2406_v56 = vsub.f32 %v466_v31, %v569_v53  ;;  %v2408_v57 = vsub.f32 %v467_v30, %v569_v53  ;;  %v2410_v58 = vsub.f32 %v468_v37, %v569_v53  ;;  %v2412_v59 = vsub.f32 %v469_v38, %v569_v53  ;;  %v736_v30 = vld [vmem:[#allocation9 + $0xc8] sm:$0xff]  ;;  %v741_v38 = vld [vmem:[#allocation9 + $0xf0] sm:$0xff] }
 0x232   :  { %v1897_v31 = vpack.c.bf16 %v736_v30, %v735_v29  ;;  %v1905_v37 = vpack.c.bf16 %v740_v36, %v739_v35  ;;  %v1909_v40 = vpack.c.bf16 %v742_v39, %v741_v38  ;;  %v717_v29 = vld [vmem:[#allocation9 + $0x58] sm:$0xff]  ;;  %v919_v38 = vld [vmem:[#allocation9 + $0x108] sm:$0xff] }
 0x233   :  { %v574_v60 = vmul.f32 %v2406_v56, %v2406_v56  ;;  %v575_v61 = vmul.f32 %v2408_v57, %v2408_v57  ;;  %v576_v62 = vmul.f32 %v2410_v58, %v2410_v58  ;;  %v577_v1 = vmul.f32 %v2412_v59, %v2412_v59  ;;  %v721_v35 = vld [vmem:[#allocation9 + $0x78] sm:$0xff] }
 0x234   :  { %1898 = vmatprep.subr.bf16.mxu0 %v1897_v31  ;;  %v1933_v30 = vpack.c.bf16 %v717_v29, %v716_v28 }
 0x235   :  { %v578_v63 = vadd.f32 %v575_v61, %v574_v60  ;;  %1900 = vmatpush3.bf16.msra.mxu0 %v1897_v31  ;;  %v718_v31 = vld [vmem:[#allocation9 + $0x60] sm:$0xff] }
 0x236   :  { %1902 = vmatprep.subr.bf16.mxu0 %v1901_v34  ;;  %v1937_v33 = vpack.c.bf16 %v719_v32, %v718_v31 }
 0x237   :  { %v579_v3 = vadd.f32 %v578_v63, %v576_v62  ;;  %v1297_v62 = vld [vmem:[%s2499_s5] ss:$0 sm:$0xff] }
 0x239   :  { %v580_v4 = vadd.f32 %v579_v3, %v577_v1  ;;  %1904 = vmatpush3.bf16.msra.mxu0 %v1901_v34  ;;  %v720_v34 = vld [vmem:[#allocation9 + $0x70] sm:$0xff] }
 0x23a   :  { %1906 = vmatprep.subr.bf16.mxu0 %v1905_v37  ;;  %v1941_v36 = vpack.c.bf16 %v721_v35, %v720_v34 }
 0x23b   :  { %v581_v6 = vrot.slane %v580_v4, 4 }
 0x23d   :  { %v582_v7 = vadd.f32 %v581_v6, %v580_v4  ;;  %1908 = vmatpush3.bf16.msra.mxu0 %v1905_v37  ;;  %v918_v37 = vld [vmem:[#allocation9 + $0x100] sm:$0xff] }
 0x23e   :  { %1910 = vmatprep.subr.bf16.mxu0 %v1909_v40  ;;  %v1945_v39 = vpack.c.bf16 %v919_v38, %v918_v37 }
 0x23f   :  { %v583_v9 = vrot.slane %v582_v7, 2 }
 0x241   :  { %v584_v10 = vadd.f32 %v583_v9, %v582_v7  ;;  %1912 = vmatpush3.bf16.msra.mxu0 %v1909_v40  ;;  %v920_v40 = vld [vmem:[#allocation9 + $0x110] sm:$0xff] }
 0x242   :  { %1914 = vmatprep.subr.bf16.mxu0 %v1913_v43  ;;  %v1949_v42 = vpack.c.bf16 %v921_v41, %v920_v40 }
 0x243   :  { %v585_v12 = vrot.slane %v584_v10, 1 }
 0x245   :  { %v586_v13 = vadd.f32 %v585_v12, %v584_v10  ;;  %v708_v12 = vld [vmem:[#allocation9 + $0x10] sm:$0xff] }
 0x247   :  { %1599 = vmatmul.mubr.f32.vlgmr.msra.gmra.mrb[6].mxu1 %v586_v13 }
 0x248   :  { %1979 = vmatpush3.bf16.msra.mxu1 %v2340_v55  ;;  %1747 = vmatprep.mubr.msk.f32.mxu1 %vm2181_vm2, %v2179_v0 }
 0x249   :  { %1980 = vmatprep.subr.bf16.mxu1 %v2180_v54 }
 0x24c   :  { %1982 = vmatpush3.bf16.msra.mxu1 %v2352_v2 }
 0x24d   :  { %1983 = vmatprep.subr.bf16.mxu1 %v2180_v54 }
 0x250   :  { %1985 = vmatpush3.bf16.msra.mxu1 %v2356_v5 }
 0x251   :  { %1986 = vmatprep.subr.bf16.mxu1 %v2180_v54 }
 0x254   :  { %1988 = vmatpush3.bf16.msra.mxu1 %v2360_v8 }
 0x255   :  { %1989 = vmatprep.subr.bf16.mxu1 %v2180_v54 }
 0x258   :  { %1991 = vmatpush3.bf16.msra.mxu1 %v2364_v11 }
 0x259   :  { %1992 = vmatprep.subr.bf16.mxu1 %v2180_v54 }
 0x25c   :  { %1994 = vmatpush3.bf16.msra.mxu1 %v2368_v14 }
 0x25d   :  { %1995 = vmatprep.subr.bf16.mxu1 %v2180_v54 }
 0x260   :  { %1997 = vmatpush3.bf16.msra.mxu1 %v2372_v17 }
 0x261   :  { %1998 = vmatprep.subr.bf16.mxu1 %v2180_v54 }
 0x264   :  { %2000 = vmatpush3.bf16.msra.mxu1 %v2376_v20 }
 0x265   :  { %2001 = vmatprep.subr.bf16.mxu1 %v2180_v54 }
 0x31a   :  { %v653_v44 = vpop.f32.mrb[6].mxu1 }
 0x31b   :  { %v657_v45 = vmul.f32 0.001953125, %v653_v44  ;;  %v1600_v46 = vpop.f32.mrb[7].mxu1  ;;  %v922_v44 = vld [vmem:[#allocation9 + $0x120] sm:$0xff] }
 0x31d   :  { %v658_v47 = vadd.f32 1e-05, %v657_v45  ;;  %v923_v45 = vld [vmem:[#allocation9 + $0x128] sm:$0xff] }
 0x31f   :  { %2051 = vrsqrt.f32 %v658_v47  ;;  %v1953_v47 = vpack.c.bf16 %v923_v45, %v922_v44 }
 0x329   :  { %v2052_v48 = vpop.eup %2051 }
 0x32a   :  { %v663_v50 = vrot.slane %v2052_v48, %v2403_v49 }
 0x32c   :  { %v664_v52 = vmul.f32 %v663_v50, %v2406_v56  ;;  %v665_v53 = vmul.f32 %v663_v50, %v2408_v57  ;;  %v666_v60 = vmul.f32 %v663_v50, %v2410_v58  ;;  %v667_v61 = vmul.f32 %v663_v50, %v2412_v59  ;;  %v709_v56 = vld [vmem:[#allocation9 + $0x18] sm:$0xff]  ;;  %v710_v59 = vld [vmem:[#allocation9 + $0x20] sm:$0xff]  ;;  %v924_v50 = vld [vmem:[#allocation9 + $0x130] sm:$0xff] }
 0x32d   :  { %v1917_v16 = vpack.c.bf16 %v709_v56, %v708_v12  ;;  %v1921_v19 = vpack.c.bf16 %v711_v18, %v710_v59 }
 0x32e   :  { %v675_v63 = vmul.f32 %v1296_v51, %v664_v52  ;;  %v676_v1 = vmul.f32 %v1296_v51, %v665_v53  ;;  %v677_v3 = vmul.f32 %v1296_v51, %v666_v60  ;;  %v678_v4 = vmul.f32 %v1296_v51, %v667_v61  ;;  %v925_v51 = vld [vmem:[#allocation9 + $0x138] sm:$0xff]  ;;  %v926_v60 = vld [vmem:[#allocation9 + $0x140] sm:$0xff]  ;;  %v927_v61 = vld [vmem:[#allocation9 + $0x148] sm:$0xff] }
 0x32f   :  { %v1957_v53 = vpack.c.bf16 %v925_v51, %v924_v50  ;;  %v1299_v51 = vld [vmem:[%s2502_s8] ss:$0 sm:$0xff]  ;;  %s2143_s8 = scalar_lea.vmem %s1268_s22, 512 }
 0x330   :  { %v686_v6 = vadd.f32 %v1297_v62, %v675_v63  ;;  %v687_v7 = vadd.f32 %v1297_v62, %v676_v1  ;;  %v688_v9 = vadd.f32 %v1297_v62, %v677_v3  ;;  %v689_v10 = vadd.f32 %v1297_v62, %v678_v4  ;;  %v928_v63 = vld [vmem:[#allocation9 + $0x150] sm:$0xff]  ;;  %v929_v1 = vld [vmem:[#allocation9 + $0x158] sm:$0xff]  ;;  %v930_v4 = vld [vmem:[#allocation9 + $0x160] sm:$0xff]  ;;  %p2144_p4 = scmp.ne.s32.totalorder %s1268_s22, %s2143_s8  ;;  %p2149_p6 = scmp.lt.s32.totalorder %s2143_s8, %s2143_s8 }
 0x331   :  { %v1961_v62 = vpack.c.bf16 %v927_v61, %v926_v60  ;;  %v1965_v3 = vpack.c.bf16 %v929_v1, %v928_v63 }
 0x332   :  { %v690_v13 = vmax.f32 %v686_v6, 0.0  ;;  %v691_v57 = vmax.f32 %v687_v7, 0.0  ;;  %v692_v15 = vmax.f32 %v688_v9, 0.0  ;;  %v693_v58 = vmax.f32 %v689_v10, 0.0  ;;  %v931_v6 = vld [vmem:[#allocation9 + $0x168] sm:$0xff]  ;;  %v932_v9 = vld [vmem:[#allocation9 + $0x170] sm:$0xff]  ;;  %p2150_p7 = por %p2149_p6, %p2148_p5 }
 0x333   :  { %v1969_v7 = vpack.c.bf16 %v931_v6, %v930_v4  ;;  %v933_v10 = vld [vmem:[#allocation9 + $0x178] sm:$0xff] }
 0x334   :  { %698 = vst [vmem:[#allocation3 + $0x1] sm:$0xff] %v690_v13  ;;  %699 = vst [vmem:[#allocation3 + $0x9] sm:$0xff] %v691_v57  ;;  %1633 = vmatprep.mubr.f32.mxu0 %v690_v13  ;;  %v1973_v12 = vpack.c.bf16 %v933_v10, %v932_v9  ;;  %p2151_p8 = pnand %p2150_p7, %p2144_p4 }
 0x335   :  { %700 = vst [vmem:[#allocation3 + $0x19] sm:$0xff] %v692_v15  ;;  %701 = vst [vmem:[#allocation3 + $0x21] sm:$0xff] %v693_v58  ;;  %1634 = vmatmul.mubr.f32.vlgmr.msra.gmra.mrb[4].mxu0 %v691_v57 }
 0x336   :  { %1916 = vmatpush3.bf16.msra.mxu0 %v1913_v43  ;;  %1636 = vmatprep.mubr.f32.mxu0 %v692_v15  ;;  %v1298_v15 = vld [vmem:[%s2501_s7] ss:$0 sm:$0xff] }
 0x337   :  { %1918 = vmatprep.subr.bf16.mxu0 %v1917_v16 }
 0x339   :  { %1637 = vmatmul.mubr.f32.gmra.mrb[6].mxu0 %v693_v58 }
 0x33a   :  { %1920 = vmatpush3.bf16.msra.mxu0 %v1917_v16 }
 0x33b   :  { %v702_v23 = vld [vmem:[#allocation3] sm:$0xff]  ;;  %1922 = vmatprep.subr.bf16.mxu0 %v1921_v19  ;;  %v703_v43 = vld [vmem:[#allocation3 + $0x8] sm:$0xff] }
 0x33c   :  { %1671 = vmatprep.mubr.f32.mxu0 %v702_v23  ;;  %v704_v46 = vld [vmem:[#allocation3 + $0x18] sm:$0xff]  ;;  %v705_v48 = vld [vmem:[#allocation3 + $0x20] sm:$0xff]  ;;  %v914_v56 = vld [vmem:[#allocation3 + $0xa] sm:$0xff] }
 0x33d   :  { %v913_v52 = vld [vmem:[#allocation3 + $0x2] sm:$0xff]  ;;  %v915_v13 = vld [vmem:[#allocation3 + $0x1a] sm:$0xff] }
 0x33e   :  { %1924 = vmatpush3.bf16.msra.mxu0 %v1921_v19  ;;  %v916_v57 = vld [vmem:[#allocation3 + $0x22] sm:$0xff] }
 0x33f   :  { %1926 = vmatprep.subr.bf16.mxu0 %v1925_v24 }
 0x342   :  { %1928 = vmatpush3.bf16.msra.mxu0 %v1925_v24 }
 0x343   :  { %1930 = vmatprep.subr.bf16.mxu0 %v1929_v27 }
 0x346   :  { %1932 = vmatpush3.bf16.msra.mxu0 %v1929_v27 }
 0x347   :  { %1934 = vmatprep.subr.bf16.mxu0 %v1933_v30 }
 0x34a   :  { %1936 = vmatpush3.bf16.msra.mxu0 %v1933_v30 }
 0x34b   :  { %1938 = vmatprep.subr.bf16.mxu0 %v1937_v33 }
 0x34e   :  { %1940 = vmatpush3.bf16.msra.mxu0 %v1937_v33 }
 0x34f   :  { %1942 = vmatprep.subr.bf16.mxu0 %v1941_v36 }
 0x352   :  { %1944 = vmatpush3.bf16.msra.mxu0 %v1941_v36 }
 0x353   :  { %1946 = vmatprep.subr.bf16.mxu0 %v1945_v39 }
 0x355   :  { %1672 = vmatmul.mubr.f32.vlgmr.msra.gmra.mrb[4].mxu0 %v703_v43 }
 0x356   :  { %1674 = vmatprep.mubr.f32.mxu0 %v704_v46  ;;  %1948 = vmatpush3.bf16.msra.mxu0 %v1945_v39 }
 0x357   :  { %1950 = vmatprep.subr.bf16.mxu0 %v1949_v42 }
 0x359   :  { %1675 = vmatmul.mubr.f32.gmra.mrb[6].mxu0 %v705_v48 }
 0x35a   :  { %1952 = vmatpush3.bf16.msra.mxu0 %v1949_v42  ;;  %1709 = vmatprep.mubr.f32.mxu0 %v913_v52 }
 0x35b   :  { %1954 = vmatprep.subr.bf16.mxu0 %v1953_v47 }
 0x35e   :  { %1956 = vmatpush3.bf16.msra.mxu0 %v1953_v47 }
 0x35f   :  { %1958 = vmatprep.subr.bf16.mxu0 %v1957_v53 }
 0x362   :  { %1960 = vmatpush3.bf16.msra.mxu0 %v1957_v53 }
 0x363   :  { %1962 = vmatprep.subr.bf16.mxu0 %v1961_v62 }
 0x366   :  { %1964 = vmatpush3.bf16.msra.mxu0 %v1961_v62  ;;  %v1300_v62 = vld [vmem:[%s2503_s9] ss:$0 sm:$0xff] }
 0x367   :  { %1966 = vmatprep.subr.bf16.mxu0 %v1965_v3 }
 0x36a   :  { %1968 = vmatpush3.bf16.msra.mxu0 %v1965_v3 }
 0x36b   :  { %1970 = vmatprep.subr.bf16.mxu0 %v1969_v7 }
 0x36e   :  { %1972 = vmatpush3.bf16.msra.mxu0 %v1969_v7 }
 0x36f   :  { %1974 = vmatprep.subr.bf16.mxu0 %v1973_v12 }
 0x372   :  { %1976 = vmatpush3.bf16.msra.mxu0 %v1973_v12 }
 0x375   :  { %1710 = vmatmul.mubr.f32.vlgmr.msra.gmra.mrb[4].mxu0 %v914_v56 }
 0x376   :  { %1712 = vmatprep.mubr.f32.mxu0 %v915_v13 }
 0x379   :  { %1713 = vmatmul.mubr.f32.gmra.mrb[6].mxu0 %v916_v57 }
 0x448   :  { %v1711_v58 = vpop.f32.mrb[4].mxu0 }
 0x449   :  { %v1000_v16 = vpop.f32.mrb[5].mxu0  ;;  %v1031_v59 = vadd.f32 %v1711_v58, %v1298_v15 }
 0x44a   :  { %v1030_v18 = vadd.f32 %v1298_v15, %v1000_v16 }
 0x44c   :  { %v1714_v19 = vpop.f32.mrb[6].mxu0  ;;  %v1034_v22 = vadd.f32 %v1031_v59, %v1030_v18 }
 0x44d   :  { %v1010_v21 = vpop.f32.mrb[7].mxu0  ;;  %v1033_v24 = vadd.f32 %v1714_v19, %v1298_v15 }
 0x44e   :  { %v1032_v23 = vadd.f32 %v1298_v15, %v1010_v21 }
 0x450   :  { %v1035_v25 = vadd.f32 %v1034_v22, %v1032_v23 }
 0x452   :  { %v1036_v26 = vadd.f32 %v1035_v25, %v1033_v24 }
 0x454   :  { %v1037_v27 = vrot.slane %v1036_v26, 4 }
 0x456   :  { %v1038_v28 = vadd.f32 %v1037_v27, %v1036_v26 }
 0x458   :  { %v1039_v29 = vrot.slane %v1038_v28, 2 }
 0x45a   :  { %v1040_v30 = vadd.f32 %v1039_v29, %v1038_v28 }
 0x45c   :  { %v1041_v31 = vrot.slane %v1040_v30, 1 }
 0x45e   :  { %v1042_v32 = vadd.f32 %v1041_v31, %v1040_v30 }
 0x460   :  { %1748 = vmatmul.mubr.f32.vlgmr.msra.gmra.mrb[8].mxu1 %v1042_v32 }
 0x461   :  { %2003 = vmatpush3.bf16.msra.mxu1 %v2340_v55  ;;  %1782 = vmatprep.mubr.msk.f32.mxu1 %vm2181_vm2, %v2179_v0 }
 0x462   :  { %2004 = vmatprep.subr.bf16.mxu1 %v2180_v54 }
 0x465   :  { %2006 = vmatpush3.bf16.msra.mxu1 %v2352_v2 }
 0x466   :  { %2007 = vmatprep.subr.bf16.mxu1 %v2180_v54 }
 0x469   :  { %2009 = vmatpush3.bf16.msra.mxu1 %v2356_v5 }
 0x46a   :  { %2010 = vmatprep.subr.bf16.mxu1 %v2180_v54 }
 0x46d   :  { %2012 = vmatpush3.bf16.msra.mxu1 %v2360_v8 }
 0x46e   :  { %2013 = vmatprep.subr.bf16.mxu1 %v2180_v54 }
 0x471   :  { %2015 = vmatpush3.bf16.msra.mxu1 %v2364_v11 }
 0x472   :  { %2016 = vmatprep.subr.bf16.mxu1 %v2180_v54 }
 0x475   :  { %2018 = vmatpush3.bf16.msra.mxu1 %v2368_v14 }
 0x476   :  { %2019 = vmatprep.subr.bf16.mxu1 %v2180_v54 }
 0x479   :  { %2021 = vmatpush3.bf16.msra.mxu1 %v2372_v17 }
 0x47a   :  { %2022 = vmatprep.subr.bf16.mxu1 %v2180_v54 }
 0x47d   :  { %2024 = vmatpush3.bf16.msra.mxu1 %v2376_v20 }
 0x533   :  { %v1125_v0 = vpop.f32.mrb[8].mxu1 }
 0x534   :  { %v1129_v55 = vmul.f32 0.001953125, %v1125_v0  ;;  %v1749_v2 = vpop.f32.mrb[9].mxu1 }
 0x536   :  { %v1133_v5 = vrot.slane %v1129_v55, %v2403_v49 }
 0x538   :  { %v1134_v8 = vsub.f32 %v1030_v18, %v1133_v5  ;;  %v1135_v33 = vsub.f32 %v1031_v59, %v1133_v5  ;;  %v1136_v11 = vsub.f32 %v1032_v23, %v1133_v5  ;;  %v1137_v34 = vsub.f32 %v1033_v24, %v1133_v5 }
 0x53a   :  { %v1138_v35 = vmul.f32 %v1134_v8, %v1134_v8  ;;  %v1139_v36 = vmul.f32 %v1135_v33, %v1135_v33  ;;  %v1140_v14 = vmul.f32 %v1136_v11, %v1136_v11  ;;  %v1141_v38 = vmul.f32 %v1137_v34, %v1137_v34 }
 0x53c   :  { %v1142_v37 = vadd.f32 %v1139_v36, %v1138_v35 }
 0x53e   :  { %v1143_v39 = vadd.f32 %v1142_v37, %v1140_v14 }
 0x540   :  { %v1144_v17 = vadd.f32 %v1143_v39, %v1141_v38 }
 0x542   :  { %v1145_v40 = vrot.slane %v1144_v17, 4 }
 0x544   :  { %v1146_v54 = vadd.f32 %v1145_v40, %v1144_v17 }
 0x546   :  { %v1147_v41 = vrot.slane %v1146_v54, 2 }
 0x548   :  { %v1148_v20 = vadd.f32 %v1147_v41, %v1146_v54 }
 0x54a   :  { %v1149_v42 = vrot.slane %v1148_v20, 1 }
 0x54c   :  { %v1150_v43 = vadd.f32 %v1149_v42, %v1148_v20 }
 0x54e   :  { %1783 = vmatmul.mubr.f32.vlgmr.msra.gmra.mrb[10].mxu1 %v1150_v43 }
 0x621   :  { %v1217_v44 = vpop.f32.mrb[10].mxu1 }
 0x622   :  { %v1221_v45 = vmul.f32 0.001953125, %v1217_v44  ;;  %v1784_v46 = vpop.f32.mrb[11].mxu1 }
 0x624   :  { %v1222_v47 = vadd.f32 1e-05, %v1221_v45 }
 0x626   :  { %2053 = vrsqrt.f32 %v1222_v47 }
 0x630   :  { %v2054_v48 = vpop.eup %2053 }
 0x631   :  { %v1227_v50 = vrot.slane %v2054_v48, %v2403_v49 }
 0x633   :  { %v1228_v52 = vmul.f32 %v1227_v50, %v1134_v8  ;;  %v1229_v53 = vmul.f32 %v1227_v50, %v1135_v33  ;;  %v1230_v60 = vmul.f32 %v1227_v50, %v1136_v11  ;;  %v1231_v61 = vmul.f32 %v1227_v50, %v1137_v34 }
 0x635   :  { %v1239_v63 = vmul.f32 %v1299_v51, %v1228_v52  ;;  %v1240_v1 = vmul.f32 %v1299_v51, %v1229_v53  ;;  %v1241_v3 = vmul.f32 %v1299_v51, %v1230_v60  ;;  %v1242_v4 = vmul.f32 %v1299_v51, %v1231_v61 }
 0x637   :  { %v1250_v6 = vadd.f32 %v1300_v62, %v1239_v63  ;;  %v1251_v49 = vadd.f32 %v1300_v62, %v1240_v1  ;;  %v1252_v7 = vadd.f32 %v1300_v62, %v1241_v3  ;;  %v1253_v9 = vadd.f32 %v1300_v62, %v1242_v4 }
 0x639   :  { %v1254_v10 = vmax.f32 %v1250_v6, 0.0  ;;  %v1255_v12 = vmax.f32 %v1251_v49, 0.0  ;;  %v1256_v56 = vmax.f32 %v1252_v7, 0.0  ;;  %v1257_v13 = vmax.f32 %v1253_v9, 0.0 }
 0x63b   :  { %1258 = vst [vmem:[#allocation12] sm:$0xff] %v1254_v10  ;;  %1259 = vst [vmem:[#allocation12 + $0x8] sm:$0xff] %v1255_v12 }
 0x63c   :  { %1260 = vst [vmem:[#allocation12 + $0x10] sm:$0xff] %v1256_v56  ;;  %1261 = vst [vmem:[#allocation12 + $0x18] sm:$0xff] %v1257_v13 }
 0x63d   :  { %2154 = shalt.err (!%p2151_p8)
}
 0x63e   :  { %s2155_s2 = scalar_lea.hbm %s2505_s11, 512 }
 0x63f   :  { %p2156_p9 = scmp.ne.s32.totalorder %s2505_s11, %s2155_s2  ;;  %p2159_p10 = scmp.lt.u32.totalorder %s2155_s2, %s2505_s11 }
 0x641   :  { %p2161_p11 = pnand %p2159_p10, %p2156_p9 }
 0x643   :  { %2164 = shalt.err (!%p2161_p11)
}
 0x644   :  { %1273 = dma.vmem_to_hbm [thread:$0]  %s1268_s22, 512, %s2505_s11, [#allocation6], %s2175_s29, %s2175_s29, %s2176_s30  }
 0x645   :  { %2171 = dma.done.wait [#allocation6], 512  }
 0x646   :  { %2172 = vsyncadd [#allocation6], 4294966784 }
 0x647   :  { %1277 = vsyncpa [#allocation5], 1 }
 0x648   :  { %1278 = vsyncpa [#allocation8], 1 }
 0x649   :  { %1279 = vsyncpa [#allocation11], 1 }
 0x64a   :  { %1280 = vsyncpa [#allocation6], 1 }

</bundles_post_ra>
